<compile_context>
chip_gen: v7x
topology: tpu7x:2x2x1
jax: 0.10.0
libtpu: 0.0.40
codegen_flags: <defaults>
</compile_context>

<pallas_src>
import math
import functools

import jax
import jax.numpy as jnp
from jax import lax
from jax.experimental import pallas as pl
from jax.experimental.pallas import tpu as pltpu

_MiB = 1024 * 1024


# ----------------------------- small helpers -----------------------------

def _ceil_div(a, b):
    return -(-a // b)


def _round_up(a, b):
    return _ceil_div(a, b) * b


def get_extra_padding_for_conv1d(length, kernel_size, stride, padding_total=0):
    """Integer-exact version of the PyTorch float formula."""
    num = length - kernel_size + padding_total
    ideal_length = _ceil_div(num, stride) * stride + (kernel_size - padding_total)
    return ideal_length - length


def pad1d_jax(x, paddings, mode='zero', value=0.0):
    """x: (B, C, T). Mirrors pad1d from the PyTorch module."""
    padding_left, padding_right = paddings
    assert padding_left >= 0 and padding_right >= 0
    if mode == 'reflect':
        length = x.shape[-1]
        max_pad = max(padding_left, padding_right)
        extra_pad = 0
        if length <= max_pad:
            extra_pad = max_pad - length + 1
            x = jnp.pad(x, ((0, 0), (0, 0), (0, extra_pad)))
        padded = jnp.pad(x, ((0, 0), (0, 0), (padding_left, padding_right)),
                         mode='reflect')
        end = padded.shape[-1] - extra_pad
        return padded[..., :end]
    else:
        return jnp.pad(x, ((0, 0), (0, 0), (padding_left, padding_right)),
                       mode='constant', constant_values=value)


# ----------------------------- generation-aware VMEM budgeting -----------------------------

def _tpu_vmem_bytes():
    try:
        info = pltpu.get_tpu_info()
        v = int(getattr(info, "vmem_capacity_bytes", 0))
        if v > 0:
            return v
    except Exception:
        pass
    return 64 * _MiB   # conservative default (v7x per-core VMEM)


def _estimate_vmem(tile_t, r_max, C_f, C_out, R, in_isz, out_isz):
    """Rough per-call VMEM footprint (double-buffered blocked specs)."""
    lane, sub = 128, 8
    Wp = _round_up(tile_t + r_max, lane)
    Tp = _round_up(tile_t, lane)
    Cfp = _round_up(max(C_f, 1), sub)
    Cfl = _round_up(max(C_f, 1), lane)
    Cop = _round_up(max(C_out, 1), sub)
    b = 0
    b += 2 * Cfp * Wp * in_isz          # input window blocks (double buffered)
    b += 2 * R * Cop * Cfl * in_isz     # weight slabs (constant index, still 2 bufs)
    b += 2 * Cop * lane * 4             # bias
    b += 2 * Cop * Tp * out_isz         # output blocks (double buffered)
    b += 3 * Cop * Tp * 4               # f32 accumulator / matmul staging headroom
    return b


_TILE_CANDIDATES = (2048, 1536, 1024, 768, 512, 384, 256, 128)


def _pick_tile_t(T_out, B, est_fn, budget):
    # Short signals: one tile along time (output block == full time extent).
    short_cut = 512 if B >= 2 else 256     # keep >= 2 time tiles for v7x megacore when B == 1
    if T_out <= short_cut and est_fn(T_out) <= budget:
        return T_out
    for t in _TILE_CANDIDATES:
        if t >= T_out:
            continue                       # also guarantees n_t >= 2
        if est_fn(t) <= budget:
            return t
    return min(T_out, 128)


# ----------------------------- Pallas kernel -----------------------------

def _sconv1d_kernel(x_ref, w_ref, b_ref, o_ref, *, tile_t, r_list):
    # x_ref: (1, 1, C_f, tile_t + r_max)   folded window, channels in sublanes, time in lanes
    # w_ref: (R, C_out, C_f)               one weight slab per distinct folded-row offset r
    # b_ref: (C_out, 1) float32
    # o_ref: (1, C_out, tile_t)            NCT output tile, time lane-dense
    acc = None
    for i, r in enumerate(r_list):
        xi = x_ref[0, 0, :, r:r + tile_t]                     # (C_f, tile_t)
        part = jnp.dot(w_ref[i], xi, preferred_element_type=jnp.float32)
        acc = part if acc is None else acc + part             # f32 accumulation (MRB on v7x)
    o_ref[0, :, :] = (acc + b_ref[...]).astype(o_ref.dtype)


# ----------------------------- wrapper -----------------------------

def sconv1d(x, weight, bias, *, stride=1, dilation=1, groups=1,
            causal=False, pad_mode='reflect', compute_dtype=None, out_dtype=None):
    """SConv1d forward.  x: (B, C_in, T)  ->  (B, C_out, T_out)  (NCT in/out)."""
    B, C_in, T = x.shape
    C_out, Cin_g, K = weight.shape
    assert C_in == Cin_g * groups and C_out % groups == 0
    Cout_g = C_out // groups
    out_dtype = out_dtype if out_dtype is not None else x.dtype

    # ---- streaming-conv padding (same math as the PyTorch module) ----
    k_eff = (K - 1) * dilation + 1
    padding_total = k_eff - stride
    extra_padding = get_extra_padding_for_conv1d(T, k_eff, stride, padding_total)
    if causal:
        x_pad = pad1d_jax(x, (padding_total, extra_padding), mode=pad_mode)
    else:
        padding_right = padding_total // 2
        padding_left = padding_total - padding_right
        x_pad = pad1d_jax(x, (padding_left, padding_right + extra_padding),
                          mode=pad_mode)
    T_pad = x_pad.shape[-1]
    T_out = (T_pad - k_eff) // stride + 1

    cdt = compute_dtype if compute_dtype is not None else x_pad.dtype
    x_pad = x_pad.astype(cdt)
    weight = weight.astype(cdt)
    in_isz = jnp.dtype(cdt).itemsize
    out_isz = jnp.dtype(out_dtype).itemsize

    # ---- tap -> (folded row offset r, stride phase p) bookkeeping ----
    C_f = stride * C_in                                     # folded channels: index = p*C_in + c
    r_of_k = [(k * dilation) // stride for k in range(K)]
    r_list = tuple(sorted(set(r_of_k)))
    r_index = {r: i for i, r in enumerate(r_list)}
    R = len(r_list)
    r_max = r_list[-1]

    # ---- generation-aware time tiling ----
    phys = _tpu_vmem_bytes()
    budget = max(16 * _MiB, (phys * 3) // 8)                # ~48 MiB v5e/v6e, ~24 MiB v7x
    est_fn = lambda t: _estimate_vmem(t, r_max, C_f, C_out, R, in_isz, out_isz)
    tile_t = _pick_tile_t(T_out, B, est_fn, budget)
    n_t = _ceil_div(T_out, tile_t)
    est = est_fn(tile_t)
    vmem_limit = int(max(16 * _MiB, min((phys * 7) // 8, est + 8 * _MiB)))

    # ---- build overlapped folded windows (B, n_t, C_f, W), gather-free ----
    W = tile_t + r_max
    n_chunks = _ceil_div(W, tile_t)
    rows_ext = (n_t + n_chunks - 1) * tile_t
    L_ext = rows_ext * stride
    assert L_ext >= T_pad
    x_ext = jnp.pad(x_pad, ((0, 0), (0, 0), (0, L_ext - T_pad)))
    xt = x_ext.reshape(B, C_in, rows_ext // tile_t, tile_t, stride)
    xt = jnp.transpose(xt, (0, 2, 4, 1, 3)).reshape(B, rows_ext // tile_t, C_f, tile_t)
    chunks = []
    for c in range(n_chunks):
        width = min((c + 1) * tile_t, W) - c * tile_t
        chunks.append(xt[:, c:c + n_t, :, :width])
    windows = chunks[0] if n_chunks == 1 else jnp.concatenate(chunks, axis=-1)

    # ---- weight slabs: one (C_out, C_f) slab per distinct r, block-diagonal over groups ----
    w_slabs = jnp.zeros((R, C_out, C_f), dtype=cdt)
    for k in range(K):
        ri = r_index[r_of_k[k]]
        p = (k * dilation) % stride
        for g in range(groups):
            w_slabs = w_slabs.at[
                ri,
                g * Cout_g:(g + 1) * Cout_g,
                p * C_in + g * Cin_g: p * C_in + (g + 1) * Cin_g,
            ].set(weight[g * Cout_g:(g + 1) * Cout_g, :, k])
    b2 = bias.reshape(C_out, 1).astype(jnp.float32)

    kernel = functools.partial(_sconv1d_kernel, tile_t=tile_t, r_list=r_list)

    flops = 2 * B * n_t * tile_t * R * C_f * C_out
    bytes_accessed = (windows.size * in_isz + w_slabs.size * in_isz
                      + b2.size * 4 + B * C_out * T_out * out_isz)

    return pl.pallas_call(
        kernel,
        out_shape=jax.ShapeDtypeStruct((B, C_out, T_out), out_dtype),
        grid_spec=pltpu.PrefetchScalarGridSpec(
            num_scalar_prefetch=0,
            grid=(B, n_t),
            in_specs=[
                pl.BlockSpec((1, 1, C_f, W), lambda b, t: (b, t, 0, 0)),
                pl.BlockSpec((R, C_out, C_f), lambda b, t: (0, 0, 0)),
                pl.BlockSpec((C_out, 1), lambda b, t: (0, 0)),
            ],
            out_specs=pl.BlockSpec((1, C_out, tile_t), lambda b, t: (b, 0, t)),
        ),
        compiler_params=pltpu.CompilerParams(
            dimension_semantics=("parallel", "parallel"),
            vmem_limit_bytes=vmem_limit),
        cost_estimate=pl.CostEstimate(flops=flops, transcendentals=0,
                                      bytes_accessed=bytes_accessed),
    )(windows, w_slabs, b2)


# ----------------------------- pure-JAX reference -----------------------------

def sconv1d_ref(x, weight, bias, *, stride=1, dilation=1, groups=1,
                causal=False, pad_mode='reflect'):
    B, C_in, T = x.shape
    C_out, Cin_g, K = weight.shape
    k_eff = (K - 1) * dilation + 1
    padding_total = k_eff - stride
    extra_padding = get_extra_padding_for_conv1d(T, k_eff, stride, padding_total)
    if causal:
        x_pad = pad1d_jax(x, (padding_total, extra_padding), mode=pad_mode)
    else:
        pr = padding_total // 2
        pl_ = padding_total - pr
        x_pad = pad1d_jax(x, (pl_, pr + extra_padding), mode=pad_mode)
    y = lax.conv_general_dilated(
        x_pad, weight, window_strides=(stride,), padding='VALID',
        rhs_dilation=(dilation,), feature_group_count=groups,
        dimension_numbers=('NCH', 'OIH', 'NCH'))
    return y + bias.reshape(1, C_out, 1)


# ----------------------------- demo -----------------------------

def _run_case(name, *, B, C_in, C_out, K, T, stride, dilation, groups,
              causal, pad_mode, compute_dtype=None, atol=1e-3, rtol=1e-3, seed=0):
    key = jax.random.PRNGKey(seed)
    kx, kw, kb = jax.random.split(key, 3)
    x = jax.random.normal(kx, (B, C_in, T), dtype=jnp.float32)
    fan_in = (C_in // groups) * K
    bound = 1.0 / math.sqrt(fan_in)
    w = jax.random.uniform(kw, (C_out, C_in // groups, K),
                           minval=-bound, maxval=bound, dtype=jnp.float32)
    b = jax.random.uniform(kb, (C_out,), minval=-bound, maxval=bound,
                           dtype=jnp.float32)

    fn = jax.jit(functools.partial(
        sconv1d, stride=stride, dilation=dilation, groups=groups,
        causal=causal, pad_mode=pad_mode, compute_dtype=compute_dtype))
    y = jax.block_until_ready(fn(x, w, b))

    y_ref = sconv1d_ref(x, w, b, stride=stride, dilation=dilation,
                        groups=groups, causal=causal, pad_mode=pad_mode)
    assert y.shape == y_ref.shape, (name, y.shape, y_ref.shape)
    err = float(jnp.max(jnp.abs(y.astype(jnp.float32) - y_ref)))
    assert jnp.allclose(y.astype(jnp.float32), y_ref, atol=atol, rtol=rtol), (name, err)


if __name__ == "__main__":
    # SConv1d defaults: causal=False, norm='none', pad_mode='reflect', bias=True
    _run_case("k3_s1", B=2, C_in=4, C_out=8, K=3, T=16,
              stride=1, dilation=1, groups=1, causal=False, pad_mode='reflect')
    # downsampling conv path: stride fold + groups (block-diagonal weight slabs)
    _run_case("k4_s2_g2", B=1, C_in=4, C_out=8, K=4, T=16,
              stride=2, dilation=1, groups=2, causal=False, pad_mode='reflect')
    # dilated causal path
    _run_case("k3_d2_causal", B=1, C_in=3, C_out=5, K=3, T=16,
              stride=1, dilation=2, groups=1, causal=True, pad_mode='reflect')
    # bf16 MXU inputs (f32 accumulation / f32 epilogue) -> looser tolerance
    _run_case("k3_s1_bf16", B=2, C_in=4, C_out=8, K=3, T=16,
              stride=1, dilation=1, groups=1, causal=False, pad_mode='reflect',
              compute_dtype=jnp.bfloat16, atol=5e-2, rtol=5e-2)
    print("KERNEL_OK")
</pallas_src>

<mosaic_0001>
module attributes {stable_mosaic.version = 11 : i64} {
  func.func @_sconv1d_kernel(%arg0: i32, %arg1: i32, %arg2: memref<1x1x4x18xf32, #tpu.memory_space<vmem>>, %arg3: memref<3x8x4xf32, #tpu.memory_space<vmem>>, %arg4: memref<8x1xf32, #tpu.memory_space<vmem>>, %arg5: memref<1x8x16xf32, #tpu.memory_space<vmem>>) attributes {dimension_semantics = [#tpu.dimension_semantics<parallel>, #tpu.dimension_semantics<parallel>], iteration_bounds = array<i64: 2, 1>, scalar_prefetch = 0 : i64, scratch_operands = 0 : i64, tpu.core_type = #tpu.core_type<tc>, window_params = [{transform_indices = @transform_0, window_bounds = array<i64: 1, 1, 4, 18>}, {pipeline_mode = #tpu.pipeline_mode<synchronous>, transform_indices = @transform_1, window_bounds = array<i64: 3, 8, 4>}, {pipeline_mode = #tpu.pipeline_mode<synchronous>, transform_indices = @transform_2, window_bounds = array<i64: 8, 1>}, {transform_indices = @transform_3, window_bounds = array<i64: 1, 8, 16>}]} {
    %c0 = arith.constant 0 : index
    %c0_0 = arith.constant 0 : index
    %c0_1 = arith.constant 0 : index
    %c0_2 = arith.constant 0 : index
    %0 = vector.load %arg2[%c0, %c0_0, %c0_1, %c0_2] : memref<1x1x4x18xf32, #tpu.memory_space<vmem>>, vector<1x1x4x16xf32>
    %1 = vector.shape_cast %0 : vector<1x1x4x16xf32> to vector<4x16xf32>
    %c0_3 = arith.constant 0 : index
    %c0_4 = arith.constant 0 : index
    %c0_5 = arith.constant 0 : index
    %2 = vector.load %arg3[%c0_3, %c0_4, %c0_5] : memref<3x8x4xf32, #tpu.memory_space<vmem>>, vector<1x8x4xf32>
    %3 = vector.shape_cast %2 : vector<1x8x4xf32> to vector<8x4xf32>
    %cst = arith.constant dense<0.000000e+00> : vector<8x16xf32>
    %4 = tpu.matmul %3, %1, %cst {dimension_numbers = #tpu.dot_dimension_numbers<[1], [0], [0], [1], [0, 0, 1, 1], [], []>} : vector<8x4xf32>, vector<4x16xf32>, vector<8x16xf32> -> vector<8x16xf32>
    %c0_6 = arith.constant 0 : index
    %c0_7 = arith.constant 0 : index
    %c0_8 = arith.constant 0 : index
    %c1 = arith.constant 1 : index
    %5 = vector.load %arg2[%c0_6, %c0_7, %c0_8, %c1] : memref<1x1x4x18xf32, #tpu.memory_space<vmem>>, vector<1x1x4x16xf32>
    %6 = vector.shape_cast %5 : vector<1x1x4x16xf32> to vector<4x16xf32>
    %c1_9 = arith.constant 1 : index
    %c0_10 = arith.constant 0 : index
    %c0_11 = arith.constant 0 : index
    %7 = vector.load %arg3[%c1_9, %c0_10, %c0_11] : memref<3x8x4xf32, #tpu.memory_space<vmem>>, vector<1x8x4xf32>
    %8 = vector.shape_cast %7 : vector<1x8x4xf32> to vector<8x4xf32>
    %cst_12 = arith.constant dense<0.000000e+00> : vector<8x16xf32>
    %9 = tpu.matmul %8, %6, %cst_12 {dimension_numbers = #tpu.dot_dimension_numbers<[1], [0], [0], [1], [0, 0, 1, 1], [], []>} : vector<8x4xf32>, vector<4x16xf32>, vector<8x16xf32> -> vector<8x16xf32>
    %10 = arith.addf %4, %9 : vector<8x16xf32>
    %c0_13 = arith.constant 0 : index
    %c0_14 = arith.constant 0 : index
    %c0_15 = arith.constant 0 : index
    %c2 = arith.constant 2 : index
    %11 = vector.load %arg2[%c0_13, %c0_14, %c0_15, %c2] : memref<1x1x4x18xf32, #tpu.memory_space<vmem>>, vector<1x1x4x16xf32>
    %12 = vector.shape_cast %11 : vector<1x1x4x16xf32> to vector<4x16xf32>
    %c2_16 = arith.constant 2 : index
    %c0_17 = arith.constant 0 : index
    %c0_18 = arith.constant 0 : index
    %13 = vector.load %arg3[%c2_16, %c0_17, %c0_18] : memref<3x8x4xf32, #tpu.memory_space<vmem>>, vector<1x8x4xf32>
    %14 = vector.shape_cast %13 : vector<1x8x4xf32> to vector<8x4xf32>
    %cst_19 = arith.constant dense<0.000000e+00> : vector<8x16xf32>
    %15 = tpu.matmul %14, %12, %cst_19 {dimension_numbers = #tpu.dot_dimension_numbers<[1], [0], [0], [1], [0, 0, 1, 1], [], []>} : vector<8x4xf32>, vector<4x16xf32>, vector<8x16xf32> -> vector<8x16xf32>
    %16 = arith.addf %10, %15 : vector<8x16xf32>
    %c0_20 = arith.constant 0 : index
    %c0_21 = arith.constant 0 : index
    %17 = vector.load %arg4[%c0_20, %c0_21] : memref<8x1xf32, #tpu.memory_space<vmem>>, vector<8x1xf32>
    %18 = vector.broadcast %17 : vector<8x1xf32> to vector<8x16xf32>
    %19 = arith.addf %16, %18 : vector<8x16xf32>
    %c0_22 = arith.constant 0 : index
    %c0_23 = arith.constant 0 : index
    %c0_24 = arith.constant 0 : index
    %20 = vector.load %arg5[%c0_22, %c0_23, %c0_24] : memref<1x8x16xf32, #tpu.memory_space<vmem>>, vector<1x8x16xf32>
    %21 = vector.shape_cast %20 : vector<1x8x16xf32> to vector<8x16xf32>
    %22 = vector.shape_cast %19 : vector<8x16xf32> to vector<1x8x16xf32>
    tpu.vector_store %arg5[%c0_22, %c0_23, %c0_24], %22 {strides = array<i32>} : memref<1x8x16xf32, #tpu.memory_space<vmem>>, vector<1x8x16xf32>,
    return
  }
  func.func @transform_0(%arg0: i32, %arg1: i32) -> (i32, i32, i32, i32) {
    %c0_i32 = arith.constant 0 : i32
    %c0_i32_0 = arith.constant 0 : i32
    %c0_i32_1 = arith.constant 0 : i32
    return %arg0, %arg1, %c0_i32, %c0_i32_0 : i32, i32, i32, i32
  }
  func.func @transform_1(%arg0: i32, %arg1: i32) -> (i32, i32, i32) {
    %c0_i32 = arith.constant 0 : i32
    %c0_i32_0 = arith.constant 0 : i32
    %c0_i32_1 = arith.constant 0 : i32
    %c0_i32_2 = arith.constant 0 : i32
    return %c0_i32, %c0_i32_0, %c0_i32_1 : i32, i32, i32
  }
  func.func @transform_2(%arg0: i32, %arg1: i32) -> (i32, i32) {
    %c0_i32 = arith.constant 0 : i32
    %c0_i32_0 = arith.constant 0 : i32
    %c0_i32_1 = arith.constant 0 : i32
    return %c0_i32, %c0_i32_0 : i32, i32
  }
  func.func @transform_3(%arg0: i32, %arg1: i32) -> (i32, i32, i32) {
    %c0_i32 = arith.constant 0 : i32
    %c0_i32_0 = arith.constant 0 : i32
    return %arg0, %c0_i32, %arg1 : i32, i32, i32
  }
}

</mosaic_0001>

<bundles_post_ra>
// kernel: sconv1d.1
= control target key start
LH: loop header
LB: loop body
LE: loop exit
PB: predicated region body
PF: predicated region fallthrough
CT: control target
= control target key end

     0   :  { %8 = vsyncpa [#allocation3], 0  ;;  %s866_s0 = inlined_call_operand.vmem [shape: f32[2,1,4,18], index: 0, kind: input, shape index: {}]   ;;  %s867_s1 = inlined_call_operand.vmem [shape: f32[3,8,4], index: 1, kind: input, shape index: {}]   ;;  %s868_s2 = inlined_call_operand.vmem [shape: f32[8,1], index: 2, kind: input, shape index: {}]   ;;  %s869_s3 = inlined_call_operand.hbm [shape: f32[2,8,16], index: 3, kind: output, shape index: {}]  }
   0x1   :  { %10 = vsyncpa [#allocation3 + $0x1], 0  ;;  %s733_s12 = smov 0   ;;  %s735_s13 = smov 0  }
   0x2   :  { %s737_s14 = smov 0   ;;  %s739_s15 = smov 0  }
   0x3   :  { %s741_s16 = smov 0   ;;  %s743_s17 = smov 0  }
   0x4 LB: > { %s525_s18 = sadd.s32 4294967295, %s705_s17   ;;  %s526_s19 = sadd.s32 4294967294, %s705_s17   ;;  %s705_s17 = sphi %s743_s17, %s16_s17   ;;  %s701_s16 = sphi %s741_s16, %s876_s16   ;;  %s697_s15 = sphi %s739_s15, %s875_s15   ;;  %s693_s14 = sphi %s737_s14, %s874_s14   ;;  %s689_s13 = sphi %s735_s13, %s873_s13   ;;  %s685_s12 = sphi %s733_s12, %s872_s12  }
   0x5   : > { %s28_s20 = sadd.s32 1, %s701_s16  ;;  %s107_s21 = sadd.s32 1, %s693_s14 }
   0x6   : > { %p30_p0 = scmp.ge.s32.totalorder %s28_s20, 2  ;;  %p117_p1 = scmp.ne.s32.totalorder %s693_s14, %s689_s13 }
   0x7   : > { %p118_p2 = scmp.eq.s32.totalorder %s525_s18, 1  ;;  %p123_p3 = scmp.ne.s32.totalorder %s689_s13, %s685_s12 }
   0x8   : > { %s878_s20 = smov (%p30_p0, %s28_s20), 0  ;;  %p124_p5 = scmp.eq.s32.totalorder %s526_s19, 1 }
   0x9   : > { %p773_p4 = por %p118_p2, %p117_p1  ;;  %s102_s23 = ssub.s32 %s701_s16, %s878_s20 }
   0xa   : > { %p529_p6 = scmp.ge.s32.totalorder %s705_s17, 1  ;;  %p105_p7 = scmp.eq.s32.totalorder %s102_s23, 0 }
   0xb   : > { %p780_p8 = por %p124_p5, %p123_p3  ;;  %p158_p9 = scmp.lt.s32.totalorder %s705_s17, 3 }
   0xc   : > { %s786_s25 = scalar_select %p105_p7, %s693_s14, %s107_s21  }
   0xd   : > { %p159_p10 = pnand %p529_p6, %p158_p9 }
   0xe   : > { %p184_p11 = scmp.lt.s32.totalorder (!%p159_p10), %s697_s15, 1  ;;  %v707_v0 = vmov (!%p159_p10), 0.0   ;;  %vm708_vm0 = vmmov (!%p159_p10), 0   ;;  %v430_v1 = vld [vmem:[%s868_s2] sm:$0xff] (!%p159_p10)  ;;  %v709_v2 = vmov (!%p159_p10), 0   ;;  %vm202_vm1 = vcmask (!%p159_p10), 1043456  }
   0xf   : > { %162 = sbr.rel (%p159_p10) target bundleno = 377 (0x179), region = 32  ;;  %550 = vmatprep.subr.mxu0 (!%p159_p10), %v707_v0  ;;  %552 = vmatprep.mubr.msk.f32.mxu0 (!%p159_p10), %vm708_vm0, %v707_v0  ;;  %vm198_vm2 = vcmask (!%p159_p10), 31744   ;;  %v192_v3 = vld [vmem:[%s867_s1] sm:$0xff] (!%p159_p10)  ;;  %s710_s8 = smov (!%p159_p10), 127   ;;  %v532_v5 = vld [vmem:[%s867_s1 + $0x8] sm:$0xff] (!%p159_p10)  ;;  %v537_v7 = vld [vmem:[%s867_s1 + $0x10] sm:$0xff] (!%p159_p10) }
  0x10   : > { %555 = vmatprep.subr.mxu1 (!%p159_p10), %v707_v0  ;;  %557 = vmatprep.mubr.msk.f32.mxu1 (!%p159_p10), %vm708_vm0, %v707_v0  ;;  %s711_s9 = smov (!%p159_p10), 126   ;;  %s181_s21 = sand.u32 (!%p159_p10), 1, %s689_s13   ;;  %vm437_vm3 = vcmask (!%p159_p10), 130048  }
  0x11   : > { %625 = vset.pattern.permute.xlu1 (!%p159_p10), %v709_v2  ;;  %626 = vset.pattern.permute.xlu0 (!%p159_p10), %v709_v2  ;;  %s530_s23 = sshll.u32 (!%p159_p10), %s181_s21, 3  ;;  %s541_s26 = sshll.u32 (!%p159_p10), %s697_s15, 7 }
  0x12   : > { %433 = vperm.xlu1 (!%p159_p10), %625, %v430_v1   ;;  %s183_s27 = scalar_lea.vmem (!%p159_p10), [#allocation2], %s530_s23  ;;  %s819_s4 = scalar_lea.hbm (!%p159_p10), %s869_s3, %s541_s26 }
  0x16   : > { %s185_s28 = scalar_select %p184_p11, %s697_s15, 1 }
  0x17   : > { %s712_s15 = smov [#allocation2]  }
  0x18   : > { %s531_s29 = sshll.u32 %s185_s28, 2  ;;  %s454_s28 = sshll.u32 %s183_s27, 4  ;;  %s821_s28 = int_to_ptr.vmem [resolvable:$true] %s454_s28 }
  0x19   : > { %s190_s5 = scalar_lea.vmem %s866_s0, %s531_s29  ;;  %s627_s6 = scalar_lea.vmem %s821_s28, 128 }
  0x1a   : > { %v191_v4 = vld [vmem:[%s190_s5] sm:$0xf]  ;;  %s440_s5 = scalar_lea.sflag [#allocation3], %s181_s21  ;;  %p628_p12 = scmp.ne.s32.totalorder %s821_s28, %s627_s6 }
  0x1b   : > { %196 = vrot.lane.b32.xlu0 %v191_v4, %s710_s8  ;;  %556 = vmatpush3.msk.msra.mxu1 %vm202_vm1, %v191_v4  ;;  %s631_s7 = sshll.u32 %s712_s15, 4  ;;  %s632_s7 = int_to_ptr.vmem [resolvable:$false] %s631_s7 }
  0x1c   : > { %558 = vmatmul.mubr.msk.f32.vlgmr.msra.gmra.mrb[0].mxu1 %vm198_vm2, %v192_v3  ;;  %p629_p13 = pnand %p628_p12, %p773_p4  ;;  %s633_s8 = scalar_lea.vmem %s632_s7, 256 }
  0x1d   : > { %p634_p1 = scmp.lt.s32.totalorder %s821_s28, %s632_s7  ;;  %p635_p2 = scmp.lt.s32.totalorder %s633_s8, %s627_s6 }
  0x1e   : > { %p630_p0 = pneg %p629_p13 }
  0x1f   : > { %352 = vrot.lane.b32.xlu0 %v191_v4, %s711_s9  ;;  %p636_p3 = por %p635_p2, %p634_p1 }
  0x21   : > { %p637_p5 = pnand %p636_p3, %p630_p0 }
  0x8d   : > { %v197_v6 = vpop.permute.xlu0 %196 }
  0x8e   : > { %551 = vmatpush3.msk.msra.mxu0 %vm202_vm1, %v197_v6 }
  0x8f   : > { %553 = vmatmul.mubr.msk.f32.vlgmr.msra.gmra.mrb[0].mxu0 %vm198_vm2, %v532_v5  ;;  %560 = vmatprep.subr.mxu0 %v707_v0 }
  0x90   : > { %562 = vmatprep.mubr.msk.f32.mxu0 %vm708_vm0, %v707_v0 }
  0x91   : > { %v353_v8 = vpop.permute.xlu0 %352  ;;  %v434_v15 = vpop.permute.xlu1 %433 }
  0x92   : > { %561 = vmatpush3.msk.msra.mxu0 %vm202_vm1, %v353_v8 }
  0x93   : > { %563 = vmatmul.mubr.msk.f32.vlgmr.msra.gmra.mrb[2].mxu0 %vm198_vm2, %v537_v7 }
  0xef   : > { %v346_v9 = vpop.f32.mrb[0].mxu1 }
  0xf0   : > { %v559_v10 = vpop.f32.mrb[1].mxu1 }
 0x162   : > { %v271_v11 = vpop.f32.mrb[0].mxu0 }
 0x163   : > { %v554_v12 = vpop.f32.mrb[1].mxu0  ;;  %v347_v13 = vadd.f32 %v346_v9, %v271_v11 }
 0x166   : > { %v425_v14 = vpop.f32.mrb[2].mxu0 }
 0x167   : > { %v429_v16 = vadd.f32 %v425_v14, %v347_v13  ;;  %v564_v17 = vpop.f32.mrb[3].mxu0 }
 0x169   : > { %v436_v18 = vadd.f32 %v434_v15, %v429_v16 }
 0x16b   : > { %438 = vst.msk [vmem:[%s183_s27] sm:$0xff] %vm437_vm3, %v436_v18 }
 0x16c   : > { %640 = shalt.err (!%p637_p5)
}
 0x16d   : > { %s641_s9 = scalar_lea.hbm %s819_s4, 128  ;;  %s645_s18 = scalar_lea.hbm %s869_s3, 256 }
 0x16e   : > { %p642_p6 = scmp.ne.s32.totalorder %s819_s4, %s641_s9  ;;  %p646_p10 = scmp.lt.u32.totalorder %s819_s4, %s869_s3 }
 0x16f   : > { %p647_p11 = scmp.lt.u32.totalorder %s645_s18, %s641_s9  ;;  %p649_p13 = scmp.lt.u32.totalorder %s641_s9, %s819_s4 }
 0x170   : > { %p643_p7 = pnand %p642_p6, %p773_p4 }
 0x171   : > { %p648_p12 = por %p647_p11, %p646_p10 }
 0x172   : > { %p644_p9 = pneg %p643_p7 }
 0x173   : > { %p650_p0 = por %p649_p13, %p648_p12 }
 0x175   : > { %p651_p1 = pnand %p650_p0, %p644_p9 }
 0x177   : > { %654 = shalt.err (!%p651_p1)
}
 0x178   : > { %565 = dma.vmem_to_hbm [thread:$0]  (%p773_p4), %s821_s28, 128, %s819_s4, %s440_s5  }
 0x179 PF: > { %p571_p2 = scmp.ge.s32.totalorder %s705_s17, 2  ;;  %s466_s23 = sand.u32 1, %s685_s12  }
 0x17a   : > { %s467_s26 = scalar_lea.sflag [#allocation3], %s466_s23 }
 0x17b   : > { %p568_p3 = pnand %p571_p2, %p780_p8 }
 0x17d   : > { %680 = dma.done.wait (!%p568_p3), %s467_s26, 128  }
 0x17e   : > { %682 = vsyncadd (!%p568_p3), %s467_s26, 4294967168  ;;  %s16_s17 = sadd.s32 1, %s705_s17   ;;  %s872_s12 = smov %s689_s13 }
 0x17f   : > { %p13_p5 = scmp.ge.s32.totalorder %s16_s17, 4   ;;  %s873_s13 = smov %s693_s14 }
 0x180   : > { %s874_s14 = smov %s786_s25  ;;  %s875_s15 = smov %s701_s16 }
 0x181   : > { %s876_s16 = smov %s878_s20  ;;  %15 = sbr.rel (!%p13_p5) target bundleno = 4 (0x4), region = 69 }
 0x188   :  { %472 = vsyncpa [#allocation3], 1 }
 0x189   :  { %474 = vsyncpa [#allocation3 + $0x1], 1 }

</bundles_post_ra>
